<compile_context>
chip_gen: v7x
topology: tpu7x:2x2x1
jax: 0.10.0
libtpu: 0.0.40
codegen_flags: <defaults>
</compile_context>

<pallas_src>
import functools
import math

import jax
import jax.numpy as jnp
from jax.experimental import pallas as pl
from jax.experimental.pallas import tpu as pltpu

_LANE = 128


def _round_up(x: int, m: int) -> int:
    return ((x + m - 1) // m) * m


def _largest_tile(dim: int) -> int:
    """Largest multiple of 128 (<=512) that divides `dim` (dim is a multiple of 128)."""
    for c in (512, 384, 256):
        if dim % c == 0:
            return c
    return 128


def _block_spec(shape, index_map, *, buffer_count=None):
    """BlockSpec; optionally request explicit buffering (fallback if unsupported)."""
    if buffer_count is not None:
        try:
            return pl.BlockSpec(shape, index_map, pipeline_mode=pl.Buffered(buffer_count))
        except (TypeError, AttributeError):
            pass
    return pl.BlockSpec(shape, index_map)


def _fused_mlp_kernel(*refs, num_layers, use_bias, compute_dtype):
    """refs = (x, w0[, b0], w1[, b1], ..., out). Whole layer stack stays on-chip."""
    x_ref = refs[0]
    o_ref = refs[-1]
    per = 2 if use_bias else 1
    h = x_ref[...]                                           # (tm, K0p) in compute_dtype
    for l in range(num_layers):                              # static unroll over layers
        w_ref = refs[1 + per * l]                            # (Kp, Np) compute_dtype
        acc = jnp.dot(h, w_ref[...], preferred_element_type=jnp.float32)   # MXU, f32 acc
        if use_bias:
            acc = acc + refs[2 + per * l][...]               # (1, Np) f32 bias broadcast
        h = jnp.maximum(acc, 0.0).astype(compute_dtype)      # ReLU, carry bf16 to next layer
    o_ref[...] = h.astype(o_ref.dtype)


def _linear_relu_kernel(*refs, use_bias):
    """Fallback per-layer tiled Linear+ReLU with K-reduction grid axis."""
    if use_bias:
        x_ref, w_ref, b_ref, o_ref, acc_ref = refs
    else:
        x_ref, w_ref, o_ref, acc_ref = refs
        b_ref = None
    k = pl.program_id(2)

    @pl.when(k == 0)
    def _():
        acc_ref[...] = jnp.zeros_like(acc_ref)

    acc_ref[...] += jnp.dot(x_ref[...], w_ref[...], preferred_element_type=jnp.float32)

    @pl.when(k == pl.num_programs(2) - 1)
    def _():
        r = acc_ref[...]
        if use_bias:
            r = r + b_ref[...]
        o_ref[...] = jnp.maximum(r, 0.0).astype(o_ref.dtype)


class MLPBottomPallas:
    """JAX/Pallas equivalent of stalactite MLPBottom forward (norm=None, dropout=0)."""

    def __init__(self, input_dim, hidden_channels, *, bias=True, dropout=0.0,
                 init_weights=None, seed=0, compute_dtype=jnp.bfloat16,
                 tm_max=512, force_per_layer=False):
        # TODO(synk): Dropout(p>0) in training mode not implemented (p=0.0 default -> identity).
        # TODO(synk): multilabel BCEWithLogitsLoss criterion is a loss, not part of forward.
        # TODO(synk): init_linear_np's exact numpy init is unavailable; deterministic
        #             scaled-normal stand-in used instead (zeros for bias, as in the spec).
        self.input_dim = input_dim
        self.hidden_channels = list(hidden_channels)
        self.use_bias = bool(bias)
        self.dropout = dropout
        self.compute_dtype = compute_dtype
        self.tm_max = tm_max
        self.force_per_layer = force_per_layer

        key = jax.random.PRNGKey(0 if seed is None else seed)
        self.params_f32 = []     # un-padded (w:(K,N) f32, b or None) for reference
        self.weights_p = []      # (Kp, Np) compute_dtype, zero-padded
        self.biases_p = []       # (1, Np)  f32, zero-padded (only if bias)
        self.dims_p = []
        in_dim = input_dim
        for hdim in self.hidden_channels:
            key, wk = jax.random.split(key)
            if init_weights is not None:
                w = jnp.full((in_dim, hdim), float(init_weights), jnp.float32)
            else:
                # stored transposed vs. PyTorch as (in, out) so the kernel does x @ W
                w = jax.random.normal(wk, (in_dim, hdim), jnp.float32) / math.sqrt(in_dim)
            b = jnp.zeros((hdim,), jnp.float32)        # nn.init.zeros_(m.bias)
            self.params_f32.append((w, b if self.use_bias else None))

            Kp, Np = _round_up(in_dim, _LANE), _round_up(hdim, _LANE)
            w_p = jnp.zeros((Kp, Np), jnp.float32).at[:in_dim, :hdim].set(w)
            self.weights_p.append(w_p.astype(compute_dtype))
            if self.use_bias:
                self.biases_p.append(jnp.zeros((1, Np), jnp.float32).at[0, :hdim].set(b))
            self.dims_p.append((Kp, Np))
            in_dim = hdim

    # ------------------------------------------------------------------ forward
    @functools.partial(jax.jit, static_argnums=0)
    def forward(self, x):
        B = x.shape[0]
        cd = self.compute_dtype
        cbytes = jnp.dtype(cd).itemsize
        K0p = self.dims_p[0][0]
        NLp = self.dims_p[-1][1]
        L = len(self.dims_p)

        # single fused pad+cast: input streamed in compute dtype, lane-dense K0p
        x_p = jnp.pad(x.astype(cd), ((0, 0), (0, K0p - self.input_dim)))

        # batch tile: multiple of 16 (bf16 sublane packing); ensure >=2 grid steps when
        # B permits so dimension_semantics=("parallel",) can shard over both v7x TCs.
        if B >= 32:
            tm = min(self.tm_max, _round_up((B + 1) // 2, 16))
        else:
            tm = _round_up(max(B, 1), 16)
        grid_m = pl.cdiv(B, tm)

        # VMEM accounting: weights single-buffered (x1), input/output double-buffered,
        # plus compiler scratch for the unrolled activation chain (f32 acc + bf16 carry).
        weight_bytes = sum(Kp * Np * cbytes + (Np * 4 if self.use_bias else 0)
                           for Kp, Np in self.dims_p)
        max_np = max(Np for _, Np in self.dims_p)
        io_bytes = 2 * tm * K0p * cbytes + 2 * tm * NLp * cbytes
        act_bytes = tm * max_np * (4 + cbytes)
        need = weight_bytes + io_bytes + 2 * act_bytes

        try:
            phys_vmem = getattr(pltpu.get_tpu_info(), "vmem_capacity_bytes", 64 << 20)
        except Exception:
            phys_vmem = 64 << 20
        budget = int(phys_vmem * 0.85)

        if self.force_per_layer or need > budget:
            # resident-weights design does not fit (e.g. v7x, very wide layers)
            return self._forward_per_layer(x_p, B, tm, budget)

        vmem_limit = int(min(budget, max(int(need * 1.25), 16 << 20)))

        in_specs = [pl.BlockSpec((tm, K0p), lambda i: (i, 0))]          # streamed batch tile
        args = [x_p]
        for l, (Kp, Np) in enumerate(self.dims_p):
            # grid-invariant, fully-resident weight: single-buffered
            in_specs.append(_block_spec((Kp, Np), lambda i: (0, 0), buffer_count=1))
            args.append(self.weights_p[l])
            if self.use_bias:
                in_specs.append(_block_spec((1, Np), lambda i: (0, 0), buffer_count=1))
                args.append(self.biases_p[l])
        out_specs = pl.BlockSpec((tm, NLp), lambda i: (i, 0))

        flops = sum(2 * B * Kp * Np for Kp, Np in self.dims_p)
        cost = pl.CostEstimate(
            flops=flops, transcendentals=0,
            bytes_accessed=B * K0p * cbytes + weight_bytes + B * NLp * cbytes)

        kernel = functools.partial(_fused_mlp_kernel, num_layers=L,
                                   use_bias=self.use_bias, compute_dtype=cd)
        y_p = pl.pallas_call(
            kernel,
            out_shape=jax.ShapeDtypeStruct((B, NLp), cd),     # bf16 writeback, lane-dense
            grid_spec=pltpu.PrefetchScalarGridSpec(
                num_scalar_prefetch=0,
                grid=(grid_m,),
                in_specs=in_specs,
                out_specs=out_specs),
            compiler_params=pltpu.CompilerParams(
                dimension_semantics=("parallel",),
                vmem_limit_bytes=vmem_limit),
            cost_estimate=cost,
        )(*args)

        # strip feature padding of the last layer; caller gets f32 (tiny slice upcast)
        return y_p[:, : self.hidden_channels[-1]].astype(jnp.float32)

    # --------------------------------------------------- fallback: per-layer tiling
    def _forward_per_layer(self, x_p, B, tm, budget):
        cd = self.compute_dtype
        h = x_p
        for l, (Kp, Np) in enumerate(self.dims_p):
            tn = _largest_tile(Np)
            tk = _largest_tile(Kp)
            grid = (pl.cdiv(B, tm), Np // tn, Kp // tk)
            in_specs = [pl.BlockSpec((tm, tk), lambda i, j, k: (i, k)),
                        pl.BlockSpec((tk, tn), lambda i, j, k: (k, j))]
            args = [h, self.weights_p[l]]
            if self.use_bias:
                in_specs.append(pl.BlockSpec((1, tn), lambda i, j, k: (0, j)))
                args.append(self.biases_p[l])
            kernel = functools.partial(_linear_relu_kernel, use_bias=self.use_bias)
            h = pl.pallas_call(
                kernel,
                out_shape=jax.ShapeDtypeStruct((B, Np), cd),
                grid_spec=pltpu.PrefetchScalarGridSpec(
                    num_scalar_prefetch=0,
                    grid=grid,
                    in_specs=in_specs,
                    out_specs=pl.BlockSpec((tm, tn), lambda i, j, k: (i, j)),
                    scratch_shapes=[pltpu.VMEM((tm, tn), jnp.float32)]),
                compiler_params=pltpu.CompilerParams(
                    dimension_semantics=("parallel", "parallel", "arbitrary"),
                    vmem_limit_bytes=budget),
            )(*args)
        return h[:, : self.hidden_channels[-1]].astype(jnp.float32)


def _reference_forward(model: MLPBottomPallas, x):
    """Pure-JAX reference with the same bf16-weights / f32-accumulate / bf16-carry recipe."""
    cd = model.compute_dtype
    K0p = model.dims_p[0][0]
    h = jnp.pad(x.astype(cd), ((0, 0), (0, K0p - model.input_dim)))
    for l in range(len(model.dims_p)):
        acc = jnp.dot(h.astype(jnp.float32), model.weights_p[l].astype(jnp.float32))
        if model.use_bias:
            acc = acc + model.biases_p[l]
        h = jnp.maximum(acc, 0.0).astype(cd)
    return h[:, : model.hidden_channels[-1]].astype(jnp.float32)


if __name__ == "__main__":
    input_dim = 32
    hidden_channels = [64, 32]
    key = jax.random.PRNGKey(0)

    model = MLPBottomPallas(input_dim, hidden_channels, seed=0)

    # small batch (single tiny tile)
    key, k1 = jax.random.split(key)
    x_small = jax.random.normal(k1, (8, input_dim), dtype=jnp.float32)
    out_small = jax.block_until_ready(model.forward(x_small))
    ref_small = _reference_forward(model, x_small)
    assert out_small.shape == (8, hidden_channels[-1])
    assert jnp.allclose(out_small, ref_small, atol=2e-2, rtol=2e-2)

    # larger batch: >=2 grid steps (v7x megacore) and a ragged last tile (B % tm != 0)
    key, k2 = jax.random.split(key)
    x_big = jax.random.normal(k2, (200, input_dim), dtype=jnp.float32)
    out_big = jax.block_until_ready(model.forward(x_big))
    ref_big = _reference_forward(model, x_big)
    assert out_big.shape == (200, hidden_channels[-1])
    assert jnp.allclose(out_big, ref_big, atol=2e-2, rtol=2e-2)

    # exercise the per-layer fallback path (used when resident weights exceed VMEM budget)
    model_fb = MLPBottomPallas(input_dim, hidden_channels, seed=0, force_per_layer=True)
    out_fb = jax.block_until_ready(model_fb.forward(x_big))
    assert jnp.allclose(out_fb, ref_big, atol=2e-2, rtol=2e-2)

    print("KERNEL_OK")
</pallas_src>

<mosaic_0001>
module attributes {stable_mosaic.version = 11 : i64} {
  func.func @_fused_mlp_kernel(%arg0: i32, %arg1: memref<16x128xbf16, #tpu.memory_space<vmem>>, %arg2: memref<128x128xbf16, #tpu.memory_space<vmem>>, %arg3: memref<1x128xf32, #tpu.memory_space<vmem>>, %arg4: memref<128x128xbf16, #tpu.memory_space<vmem>>, %arg5: memref<1x128xf32, #tpu.memory_space<vmem>>, %arg6: memref<16x128xbf16, #tpu.memory_space<vmem>>) attributes {dimension_semantics = [#tpu.dimension_semantics<parallel>], iteration_bounds = array<i64: 1>, scalar_prefetch = 0 : i64, scratch_operands = 0 : i64, tpu.core_type = #tpu.core_type<tc>, window_params = [{transform_indices = @transform_0, window_bounds = array<i64: 16, 128>}, {pipeline_mode = #tpu.pipeline_mode<synchronous>, transform_indices = @transform_1, window_bounds = array<i64: 128, 128>}, {pipeline_mode = #tpu.pipeline_mode<synchronous>, transform_indices = @transform_2, window_bounds = array<i64: 1, 128>}, {pipeline_mode = #tpu.pipeline_mode<synchronous>, transform_indices = @transform_3, window_bounds = array<i64: 128, 128>}, {pipeline_mode = #tpu.pipeline_mode<synchronous>, transform_indices = @transform_4, window_bounds = array<i64: 1, 128>}, {transform_indices = @transform_5, window_bounds = array<i64: 16, 128>}]} {
    %c0 = arith.constant 0 : index
    %c0_0 = arith.constant 0 : index
    %0 = vector.load %arg1[%c0, %c0_0] : memref<16x128xbf16, #tpu.memory_space<vmem>>, vector<16x128xbf16>
    %c0_1 = arith.constant 0 : index
    %c0_2 = arith.constant 0 : index
    %1 = vector.load %arg2[%c0_1, %c0_2] : memref<128x128xbf16, #tpu.memory_space<vmem>>, vector<128x128xbf16>
    %cst = arith.constant dense<0.000000e+00> : vector<16x128xf32>
    %2 = tpu.matmul %0, %1, %cst {dimension_numbers = #tpu.dot_dimension_numbers<[1], [0], [0], [1], [0, 0, 1, 1], [], []>} : vector<16x128xbf16>, vector<128x128xbf16>, vector<16x128xf32> -> vector<16x128xf32>
    %c0_3 = arith.constant 0 : index
    %c0_4 = arith.constant 0 : index
    %3 = vector.load %arg3[%c0_3, %c0_4] : memref<1x128xf32, #tpu.memory_space<vmem>>, vector<1x128xf32>
    %4 = vector.broadcast %3 : vector<1x128xf32> to vector<16x128xf32>
    %5 = arith.addf %2, %4 : vector<16x128xf32>
    %cst_5 = arith.constant 0.000000e+00 : f32
    %6 = vector.broadcast %cst_5 : f32 to vector<16x128xf32>
    %7 = arith.maximumf %5, %6 : vector<16x128xf32>
    %8 = arith.truncf %7 : vector<16x128xf32> to vector<16x128xbf16>
    %c0_6 = arith.constant 0 : index
    %c0_7 = arith.constant 0 : index
    %9 = vector.load %arg4[%c0_6, %c0_7] : memref<128x128xbf16, #tpu.memory_space<vmem>>, vector<128x128xbf16>
    %cst_8 = arith.constant dense<0.000000e+00> : vector<16x128xf32>
    %10 = tpu.matmul %8, %9, %cst_8 {dimension_numbers = #tpu.dot_dimension_numbers<[1], [0], [0], [1], [0, 0, 1, 1], [], []>} : vector<16x128xbf16>, vector<128x128xbf16>, vector<16x128xf32> -> vector<16x128xf32>
    %c0_9 = arith.constant 0 : index
    %c0_10 = arith.constant 0 : index
    %11 = vector.load %arg5[%c0_9, %c0_10] : memref<1x128xf32, #tpu.memory_space<vmem>>, vector<1x128xf32>
    %12 = vector.broadcast %11 : vector<1x128xf32> to vector<16x128xf32>
    %13 = arith.addf %10, %12 : vector<16x128xf32>
    %cst_11 = arith.constant 0.000000e+00 : f32
    %14 = vector.broadcast %cst_11 : f32 to vector<16x128xf32>
    %15 = arith.maximumf %13, %14 : vector<16x128xf32>
    %16 = arith.truncf %15 : vector<16x128xf32> to vector<16x128xbf16>
    %c0_12 = arith.constant 0 : index
    %c0_13 = arith.constant 0 : index
    %17 = vector.load %arg6[%c0_12, %c0_13] : memref<16x128xbf16, #tpu.memory_space<vmem>>, vector<16x128xbf16>
    tpu.vector_store %arg6[%c0_12, %c0_13], %16 {strides = array<i32>} : memref<16x128xbf16, #tpu.memory_space<vmem>>, vector<16x128xbf16>,
    return
  }
  func.func @transform_0(%arg0: i32) -> (i32, i32) {
    %c0_i32 = arith.constant 0 : i32
    %c0_i32_0 = arith.constant 0 : i32
    return %arg0, %c0_i32 : i32, i32
  }
  func.func @transform_1(%arg0: i32) -> (i32, i32) {
    %c0_i32 = arith.constant 0 : i32
    %c0_i32_0 = arith.constant 0 : i32
    %c0_i32_1 = arith.constant 0 : i32
    return %c0_i32, %c0_i32_0 : i32, i32
  }
  func.func @transform_2(%arg0: i32) -> (i32, i32) {
    %c0_i32 = arith.constant 0 : i32
    %c0_i32_0 = arith.constant 0 : i32
    %c0_i32_1 = arith.constant 0 : i32
    return %c0_i32, %c0_i32_0 : i32, i32
  }
  func.func @transform_3(%arg0: i32) -> (i32, i32) {
    %c0_i32 = arith.constant 0 : i32
    %c0_i32_0 = arith.constant 0 : i32
    %c0_i32_1 = arith.constant 0 : i32
    return %c0_i32, %c0_i32_0 : i32, i32
  }
  func.func @transform_4(%arg0: i32) -> (i32, i32) {
    %c0_i32 = arith.constant 0 : i32
    %c0_i32_0 = arith.constant 0 : i32
    %c0_i32_1 = arith.constant 0 : i32
    return %c0_i32, %c0_i32_0 : i32, i32
  }
  func.func @transform_5(%arg0: i32) -> (i32, i32) {
    %c0_i32 = arith.constant 0 : i32
    %c0_i32_0 = arith.constant 0 : i32
    return %arg0, %c0_i32 : i32, i32
  }
}

</mosaic_0001>

<bundles_post_ra>
// kernel: forward.1
= control target key start
LH: loop header
LB: loop body
LE: loop exit
PB: predicated region body
PF: predicated region fallthrough
CT: control target
= control target key end

     0   :  { %10 = vsyncpa [#allocation3], 0  ;;  %s566_s0 = inlined_call_operand.vmem [shape: bf16[8,128], index: 0, kind: input, shape index: {}]   ;;  %s567_s1 = inlined_call_operand.hbm [shape: bf16[128,128], index: 1, kind: input, shape index: {}]   ;;  %s568_s2 = inlined_call_operand.vmem [shape: f32[1,128], index: 2, kind: input, shape index: {}, may-alias: {2,4}]   ;;  %s569_s3 = inlined_call_operand.hbm [shape: bf16[128,128], index: 3, kind: input, shape index: {}]   ;;  %s570_s4 = inlined_call_operand.vmem [shape: f32[1,128], index: 4, kind: input, shape index: {}, may-alias: {2,4}]   ;;  %s571_s5 = inlined_call_operand.vmem [shape: bf16[8,128], index: 5, kind: output, shape index: {}]  }
   0x1   :  { %11 = vsyncpa [#allocation5], 0  ;;  %s494_s18 = smov [#allocation2]   ;;  %s446_s22 = scalar_lea.hbm %s567_s1, 1024 }
   0x2   :  { %s19_s19 = sshll.u32 %s494_s18, 4  ;;  %p447_p0 = scmp.ne.s32.totalorder %s567_s1, %s446_s22  ;;  %s20_s19 = int_to_ptr.vmem [resolvable:$true] %s19_s19 }
   0x3   :  { %p450_p1 = scmp.lt.u32.totalorder %s446_s22, %s567_s1 }
   0x5   :  { %p452_p2 = pnand %p450_p1, %p447_p0 }
   0x7   :  { %455 = shalt.err (!%p452_p2)
}
   0x8   :  { %s456_s27 = scalar_lea.vmem %s20_s19, 1024  ;;  %p461_p4 = scmp.lt.s32.totalorder %s20_s19, %s20_s19 }
   0x9   :  { %p457_p3 = scmp.ne.s32.totalorder %s20_s19, %s456_s27  ;;  %p462_p5 = scmp.lt.s32.totalorder %s456_s27, %s456_s27 }
   0xb   :  { %p463_p6 = por %p462_p5, %p461_p4 }
   0xd   :  { %p464_p7 = pnand %p463_p6, %p457_p3 }
   0xf   :  { %467 = shalt.err (!%p464_p7)
}
  0x10   :  { %s495_s28 = smov 64   ;;  %s496_s29 = smov 4  }
  0x11   :  { %25 = dma.hbm_to_vmem [thread:$0]  %s567_s1, 1024, %s20_s19, [#allocation3], %s495_s28, %s495_s28, %s496_s29  }
  0x12   :  { %s497_s7 = smov [#allocation4]   ;;  %s468_s11 = scalar_lea.hbm %s569_s3, 1024 }
  0x13   :  { %s33_s8 = sshll.u32 %s497_s7, 4  ;;  %p469_p8 = scmp.ne.s32.totalorder %s569_s3, %s468_s11  ;;  %s34_s8 = int_to_ptr.vmem [resolvable:$true] %s33_s8 }
  0x14   :  { %p472_p9 = scmp.lt.u32.totalorder %s468_s11, %s569_s3 }
  0x16   :  { %p474_p10 = pnand %p472_p9, %p469_p8 }
  0x18   :  { %477 = shalt.err (!%p474_p10)
}
  0x19   :  { %s478_s16 = scalar_lea.vmem %s34_s8, 1024  ;;  %p483_p12 = scmp.lt.s32.totalorder %s34_s8, %s34_s8 }
  0x1a   :  { %p479_p11 = scmp.ne.s32.totalorder %s34_s8, %s478_s16  ;;  %p484_p13 = scmp.lt.s32.totalorder %s478_s16, %s478_s16 }
  0x1c   :  { %p485_p0 = por %p484_p13, %p483_p12 }
  0x1e   :  { %p486_p1 = pnand %p485_p0, %p479_p11 }
  0x20   :  { %489 = shalt.err (!%p486_p1)
}
  0x21   :  { %39 = dma.hbm_to_vmem [thread:$0]  %s569_s3, 1024, %s34_s8, [#allocation5], %s495_s28, %s495_s28, %s496_s29  }
  0x22   :  { %490 = dma.done.wait [#allocation3], 1024  }
  0x23   :  { %491 = vsyncadd [#allocation3], 4294966272 }
  0x24   :  { %492 = dma.done.wait [#allocation5], 1024  }
  0x25   :  { %493 = vsyncadd [#allocation5], 4294966272  ;;  %v498_v0 = vmov 0.0   ;;  %vm499_vm0 = vmmov 0   ;;  %v429_v1 = vld [vmem:[#allocation2] sm:$0xff]   ;;  %v430_v2 = vld [vmem:[#allocation2 + $0x8] sm:$0xff]  }
  0x26   :  { %383 = vmatprep.subr.bf16.mxu0 %v498_v0  ;;  %399 = vmatprep.mubr.msk.bf16.mxu0 %vm499_vm0, %v498_v0  ;;  %v431_v3 = vld [vmem:[#allocation2 + $0x10] sm:$0xff]   ;;  %v438_v4 = vld [vmem:[#allocation4] sm:$0xff]   ;;  %v432_v5 = vld [vmem:[#allocation2 + $0x18] sm:$0xff]  }
  0x27   :  { %403 = vmatprep.subr.bf16.mxu1 %v498_v0  ;;  %419 = vmatprep.mubr.msk.bf16.mxu1 %vm499_vm0, %v498_v0  ;;  %v439_v6 = vld [vmem:[#allocation4 + $0x8] sm:$0xff]   ;;  %v433_v7 = vld [vmem:[#allocation2 + $0x20] sm:$0xff]   ;;  %v440_v8 = vld [vmem:[#allocation4 + $0x10] sm:$0xff]  }
  0x28   :  { %384 = vmatpush3.bf16.msra.mxu0 %v429_v1  ;;  %404 = vmatpush3.bf16.msra.mxu1 %v438_v4  ;;  %v434_v9 = vld [vmem:[#allocation2 + $0x28] sm:$0xff]   ;;  %v441_v10 = vld [vmem:[#allocation4 + $0x18] sm:$0xff]   ;;  %v435_v11 = vld [vmem:[#allocation2 + $0x30] sm:$0xff]  }
  0x29   :  { %385 = vmatprep.subr.bf16.mxu0 %v498_v0  ;;  %405 = vmatprep.subr.bf16.mxu1 %v498_v0  ;;  %v442_v12 = vld [vmem:[#allocation4 + $0x20] sm:$0xff]   ;;  %v436_v13 = vld [vmem:[#allocation2 + $0x38] sm:$0xff]   ;;  %v443_v14 = vld [vmem:[#allocation4 + $0x28] sm:$0xff]  }
  0x2a   :  { %v437_v15 = vld [vmem:[%s566_s0] sm:$0xff]   ;;  %v444_v16 = vld [vmem:[#allocation4 + $0x30] sm:$0xff]   ;;  %v445_v17 = vld [vmem:[#allocation4 + $0x38] sm:$0xff]  }
  0x2b   :  { %v337_v18 = vld [vmem:[%s568_s2] ss:$0 sm:$0xff] }
  0x2c   :  { %386 = vmatpush3.bf16.msra.mxu0 %v430_v2  ;;  %406 = vmatpush3.bf16.msra.mxu1 %v439_v6  ;;  %v347_v28 = vld [vmem:[%s570_s4] ss:$0 sm:$0xff] }
  0x2d   :  { %387 = vmatprep.subr.bf16.mxu0 %v498_v0  ;;  %407 = vmatprep.subr.bf16.mxu1 %v498_v0 }
  0x30   :  { %388 = vmatpush3.bf16.msra.mxu0 %v431_v3  ;;  %408 = vmatpush3.bf16.msra.mxu1 %v440_v8 }
  0x31   :  { %389 = vmatprep.subr.bf16.mxu0 %v498_v0  ;;  %409 = vmatprep.subr.bf16.mxu1 %v498_v0 }
  0x34   :  { %390 = vmatpush3.bf16.msra.mxu0 %v432_v5  ;;  %410 = vmatpush3.bf16.msra.mxu1 %v441_v10 }
  0x35   :  { %391 = vmatprep.subr.bf16.mxu0 %v498_v0  ;;  %411 = vmatprep.subr.bf16.mxu1 %v498_v0 }
  0x38   :  { %392 = vmatpush3.bf16.msra.mxu0 %v433_v7  ;;  %412 = vmatpush3.bf16.msra.mxu1 %v442_v12 }
  0x39   :  { %393 = vmatprep.subr.bf16.mxu0 %v498_v0  ;;  %413 = vmatprep.subr.bf16.mxu1 %v498_v0 }
  0x3c   :  { %394 = vmatpush3.bf16.msra.mxu0 %v434_v9  ;;  %414 = vmatpush3.bf16.msra.mxu1 %v443_v14 }
  0x3d   :  { %395 = vmatprep.subr.bf16.mxu0 %v498_v0  ;;  %415 = vmatprep.subr.bf16.mxu1 %v498_v0 }
  0x40   :  { %396 = vmatpush3.bf16.msra.mxu0 %v435_v11  ;;  %416 = vmatpush3.bf16.msra.mxu1 %v444_v16 }
  0x41   :  { %397 = vmatprep.subr.bf16.mxu0 %v498_v0  ;;  %417 = vmatprep.subr.bf16.mxu1 %v498_v0 }
  0x44   :  { %398 = vmatpush3.bf16.msra.mxu0 %v436_v13  ;;  %418 = vmatpush3.bf16.msra.mxu1 %v445_v17 }
  0x47   :  { %400 = vmatmul.mubr.bf16.vlgmr.msra.gmra.mrb[0].mxu0 %v437_v15 }
 0x11a   :  { %v162_v19 = vpop.f32.mrb[0].mxu0 }
 0x11b   :  { %v163_v20 = vadd.f32 %v337_v18, %v162_v19  ;;  %v401_v21 = vpop.f32.mrb[1].mxu0 }
 0x11c   :  { %v165_v22 = vpop.f32.mrb[2].mxu0 }
 0x11d   :  { %v166_v23 = vadd.f32 %v337_v18, %v165_v22  ;;  %v402_v24 = vpop.f32.mrb[3].mxu0  ;;  %v169_v25 = vmax.f32 %v163_v20, 0.0 }
 0x11f   :  { %v170_v26 = vmax.f32 %v166_v23, 0.0 }
 0x121   :  { %v171_v27 = vpack.c.bf16 %v170_v26, %v169_v25 }
 0x123   :  { %420 = vmatmul.mubr.bf16.vlgmr.msra.gmra.mrb[0].mxu1 %v171_v27 }
 0x1f6   :  { %v277_v29 = vpop.f32.mrb[0].mxu1 }
 0x1f7   :  { %v278_v30 = vadd.f32 %v347_v28, %v277_v29  ;;  %v421_v31 = vpop.f32.mrb[1].mxu1 }
 0x1f8   :  { %v280_v32 = vpop.f32.mrb[2].mxu1 }
 0x1f9   :  { %v281_v33 = vadd.f32 %v347_v28, %v280_v32  ;;  %v422_v34 = vpop.f32.mrb[3].mxu1  ;;  %v284_v35 = vmax.f32 %v278_v30, 0.0 }
 0x1fb   :  { %v285_v36 = vmax.f32 %v281_v33, 0.0 }
 0x1fd   :  { %v363_v37 = vpack.c.bf16 %v285_v36, %v284_v35 }
 0x1ff   :  { %364 = vst [vmem:[#allocation6] sm:$0xff] %v363_v37  }
 0x206   :  { %v313_v38 = vld [vmem:[#allocation6] sm:$0xf] }
 0x207   :  { %314 = vst [vmem:[%s571_s5] sm:$0xf] %v313_v38 }
 0x208   :  { %331 = vsyncpa [#allocation3], 1 }
 0x209   :  { %332 = vsyncpa [#allocation5], 1 }

</bundles_post_ra>
